<compile_context>
chip_gen: v7x
topology: tpu7x:2x2x1
jax: 0.10.0
libtpu: 0.0.40
codegen_flags: <defaults>
</compile_context>

<pallas_src>
import functools

import jax
import jax.numpy as jnp
from jax.experimental import pallas as pl
from jax.experimental.pallas import tpu as pltpu


def _round_up(x, m):
    return ((x + m - 1) // m) * m


def _choose_block_rows(batch, dim, itemsize):
    """Row-block size: keep 2 (double-buffered) x TB x D x itemsize <= ~16 MiB."""
    budget = 16 * 1024 * 1024
    tb = budget // max(1, 2 * dim * itemsize)
    tb = max(8, (tb // 8) * 8)          # sublane multiple
    tb = min(tb, 1024)                  # diminishing returns past ~1K rows
    tb = min(tb, _round_up(batch, 8))   # don't over-pad tiny batches
    return tb


def _sketchy_kernel(x_ref, w_ref, b_ref, logits_ref):
    # x_ref:      [TB, D]  activation row block (native dtype, e.g. bf16/f32)
    # w_ref:      [D, 2]   linear weight, same dtype as x (transposed vs torch)
    # b_ref:      [1, 2]   linear bias (f32)
    # logits_ref: [TB, 2]  f32 logits
    logits = jnp.dot(x_ref[...], w_ref[...], preferred_element_type=jnp.float32)
    logits_ref[...] = logits + b_ref[...].astype(jnp.float32)


@functools.partial(jax.jit, static_argnames=("block_rows",))
def _sketchy_pallas(x, w, b2d, *, block_rows):
    B, D = x.shape
    assert B % block_rows == 0
    grid = (B // block_rows,)
    return pl.pallas_call(
        _sketchy_kernel,
        out_shape=jax.ShapeDtypeStruct((B, 2), jnp.float32),
        grid_spec=pltpu.PrefetchScalarGridSpec(
            num_scalar_prefetch=0,
            grid=grid,
            in_specs=[
                pl.BlockSpec((block_rows, D), lambda i: (i, 0)),  # streamed
                pl.BlockSpec((D, 2), lambda i: (0, 0)),           # resident
                pl.BlockSpec((1, 2), lambda i: (0, 0)),           # resident
            ],
            out_specs=pl.BlockSpec((block_rows, 2), lambda i: (i, 0)),
        ),
        compiler_params=pltpu.CompilerParams(
            # batch axis is embarrassingly parallel -> shard across TCs on v7x
            dimension_semantics=("parallel",),
            # large row blocks need more than the default scoped VMEM
            # (16 MiB v5e / 32 MiB v6e,v7x); 48 MiB is safe on all generations.
            vmem_limit_bytes=48 * 1024 * 1024,
        ),
    )(x, w, b2d)


class SketchyPallas:
    """JAX/Pallas port of the PyTorch `Sketchy` module."""

    def __init__(self, dim, key):
        kw, kb = jax.random.split(key)
        bound = 1.0 / jnp.sqrt(jnp.float32(dim))
        # Stored as [dim, 2] (transposed relative to torch's [2, dim]) so the
        # kernel does a plain [TB, D] x [D, 2] MXU matmul.
        # NOTE: if dim is not a multiple of 128, the full-D block still works
        # (lane padding); pre-padding D with zeros is an optional micro-opt.
        self.weight = jax.random.uniform(
            kw, (dim, 2), jnp.float32, minval=-bound, maxval=bound)
        self.bias = jax.random.uniform(
            kb, (2,), jnp.float32, minval=-bound, maxval=bound)

    def __call__(self, cls_hidden_state, is_impossibles=None):
        # Keep the activation in its native dtype (do NOT up-cast to f32 here:
        # the kernel cost is the HBM read of x, and bf16 halves it).
        x = cls_hidden_state
        B, D = x.shape
        tb = _choose_block_rows(B, D, jnp.dtype(x.dtype).itemsize)
        B_pad = _round_up(B, tb)
        if B_pad != B:
            x = jnp.pad(x, ((0, B_pad - B), (0, 0)))
        # Matched-dtype MXU operands (bf16 x bf16 -> f32 accumulate on all gens).
        w = self.weight.astype(x.dtype)

        logits = _sketchy_pallas(x, w, self.bias.reshape(1, 2), block_rows=tb)
        logits = logits[:B]

        # Score + optional loss are trivial; keeping them out of the kernel
        # avoids a second narrow-lane output DMA pipeline per grid step.
        score_ext = logits[:, 1] - logits[:, 0]

        loss = None
        if is_impossibles is not None:
            # TODO(synk): CrossEntropyLoss has no Pallas kernel here; computed
            # in plain JAX on the kernel-produced logits (negligible cost).
            logp = jax.nn.log_softmax(logits, axis=-1)
            nll = -jnp.take_along_axis(
                logp, is_impossibles[:, None].astype(jnp.int32), axis=-1)[:, 0]
            loss = jnp.mean(nll)

        return {"scores": score_ext, "logits": logits, "loss": loss}


if __name__ == "__main__":
    key = jax.random.PRNGKey(0)
    k_x, k_y, k_p = jax.random.split(key, 3)

    B, D = 8, 32
    cls_hidden_state = jax.random.normal(k_x, (B, D), jnp.float32)
    is_impossibles = jax.random.randint(k_y, (B,), 0, 2, jnp.int32)

    model = SketchyPallas(D, k_p)

    # f32 path
    out = model(cls_hidden_state, is_impossibles)
    jax.block_until_ready(out["scores"])
    jax.block_until_ready(out["loss"])

    ref_logits = cls_hidden_state @ model.weight + model.bias
    ref_scores = ref_logits[:, 1] - ref_logits[:, 0]
    assert jnp.allclose(out["logits"], ref_logits, atol=1e-5, rtol=1e-5)
    assert jnp.allclose(out["scores"], ref_scores, atol=1e-5, rtol=1e-5)
    assert out["scores"].shape == (B,)
    assert out["loss"].shape == ()

    # bf16 path (half the HBM traffic) — looser tolerance vs bf16-input reference.
    x_bf16 = cls_hidden_state.astype(jnp.bfloat16)
    out_bf16 = model(x_bf16)
    jax.block_until_ready(out_bf16["scores"])
    ref_bf16 = (x_bf16.astype(jnp.float32)
                @ model.weight.astype(jnp.bfloat16).astype(jnp.float32)
                + model.bias)
    assert jnp.allclose(out_bf16["logits"], ref_bf16, atol=1e-2, rtol=1e-2)
    assert out_bf16["loss"] is None

    print("KERNEL_OK")
</pallas_src>

<mosaic_0001>
module attributes {stable_mosaic.version = 11 : i64} {
  func.func @_sketchy_kernel(%arg0: i32, %arg1: memref<8x32xf32, #tpu.memory_space<vmem>>, %arg2: memref<32x2xf32, #tpu.memory_space<vmem>>, %arg3: memref<1x2xf32, #tpu.memory_space<vmem>>, %arg4: memref<8x2xf32, #tpu.memory_space<vmem>>) attributes {dimension_semantics = [#tpu.dimension_semantics<parallel>], iteration_bounds = array<i64: 1>, scalar_prefetch = 0 : i64, scratch_operands = 0 : i64, tpu.core_type = #tpu.core_type<tc>, window_params = [{transform_indices = @transform_0, window_bounds = array<i64: 8, 32>}, {pipeline_mode = #tpu.pipeline_mode<synchronous>, transform_indices = @transform_1, window_bounds = array<i64: 32, 2>}, {pipeline_mode = #tpu.pipeline_mode<synchronous>, transform_indices = @transform_2, window_bounds = array<i64: 1, 2>}, {transform_indices = @transform_3, window_bounds = array<i64: 8, 2>}]} {
    %c0 = arith.constant 0 : index
    %c0_0 = arith.constant 0 : index
    %0 = vector.load %arg1[%c0, %c0_0] : memref<8x32xf32, #tpu.memory_space<vmem>>, vector<8x32xf32>
    %c0_1 = arith.constant 0 : index
    %c0_2 = arith.constant 0 : index
    %1 = vector.load %arg2[%c0_1, %c0_2] : memref<32x2xf32, #tpu.memory_space<vmem>>, vector<32x2xf32>
    %cst = arith.constant dense<0.000000e+00> : vector<8x2xf32>
    %2 = tpu.matmul %0, %1, %cst {dimension_numbers = #tpu.dot_dimension_numbers<[1], [0], [0], [1], [0, 0, 1, 1], [], []>} : vector<8x32xf32>, vector<32x2xf32>, vector<8x2xf32> -> vector<8x2xf32>
    %c0_3 = arith.constant 0 : index
    %c0_4 = arith.constant 0 : index
    %3 = vector.load %arg3[%c0_3, %c0_4] : memref<1x2xf32, #tpu.memory_space<vmem>>, vector<1x2xf32>
    %4 = vector.broadcast %3 : vector<1x2xf32> to vector<8x2xf32>
    %5 = arith.addf %2, %4 : vector<8x2xf32>
    %c0_5 = arith.constant 0 : index
    %c0_6 = arith.constant 0 : index
    %6 = vector.load %arg4[%c0_5, %c0_6] : memref<8x2xf32, #tpu.memory_space<vmem>>, vector<8x2xf32>
    tpu.vector_store %arg4[%c0_5, %c0_6], %5 {strides = array<i32>} : memref<8x2xf32, #tpu.memory_space<vmem>>, vector<8x2xf32>,
    return
  }
  func.func @transform_0(%arg0: i32) -> (i32, i32) {
    %c0_i32 = arith.constant 0 : i32
    %c0_i32_0 = arith.constant 0 : i32
    return %arg0, %c0_i32 : i32, i32
  }
  func.func @transform_1(%arg0: i32) -> (i32, i32) {
    %c0_i32 = arith.constant 0 : i32
    %c0_i32_0 = arith.constant 0 : i32
    %c0_i32_1 = arith.constant 0 : i32
    return %c0_i32, %c0_i32_0 : i32, i32
  }
  func.func @transform_2(%arg0: i32) -> (i32, i32) {
    %c0_i32 = arith.constant 0 : i32
    %c0_i32_0 = arith.constant 0 : i32
    %c0_i32_1 = arith.constant 0 : i32
    return %c0_i32, %c0_i32_0 : i32, i32
  }
  func.func @transform_3(%arg0: i32) -> (i32, i32) {
    %c0_i32 = arith.constant 0 : i32
    %c0_i32_0 = arith.constant 0 : i32
    return %arg0, %c0_i32 : i32, i32
  }
}

</mosaic_0001>

<bundles_post_ra>
// kernel: _sketchy_pallas.1
= control target key start
LH: loop header
LB: loop body
LE: loop exit
PB: predicated region body
PF: predicated region fallthrough
CT: control target
= control target key end

     0   :  { %v133_v0 = vmov 0.0|0.0   ;;  %vm134_vm0 = vmmov 0   ;;  %v135_v4 = vmov 0.0   ;;  %vm26_vm1 = vcmask 261120   ;;  %s177_s1 = inlined_call_operand.vmem [shape: f32[32,2], index: 1, kind: input, shape index: {}]   ;;  %s178_s0 = inlined_call_operand.vmem [shape: f32[8,32], index: 0, kind: input, shape index: {}]   ;;  %s179_s2 = inlined_call_operand.vmem [shape: f32[1,2], index: 2, kind: input, shape index: {}]   ;;  %s180_s3 = inlined_call_operand.vmem [shape: f32[8,2], index: 3, kind: output, shape index: {}]  }
   0x1   :  { %124 = vmatprep.subr.bf16.mxu0 %v133_v0  ;;  %v15_v1 = vld [vmem:[%s177_s1] sm:$0xff]  ;;  %v16_v2 = vld [vmem:[%s177_s1 + $0x8] sm:$0xff]  ;;  %v17_v3 = vld [vmem:[%s177_s1 + $0x10] sm:$0xff]  ;;  %121 = vmatprep.mubr.msk.f32.mxu0 %vm134_vm0, %v135_v4  ;;  %vm100_vm2 = vcmask 15360  }
   0x2   :  { %v125_v5 = vpack.c.bf16 %v16_v2, %v15_v1  ;;  %v18_v6 = vld [vmem:[%s177_s1 + $0x18] sm:$0xff]  ;;  %v14_v8 = vld [vmem:[%s178_s0] sm:$0xff] }
   0x3   :  { %v128_v7 = vpack.c.bf16 %v18_v6, %v17_v3  ;;  %v106_v9 = vld [vmem:[%s179_s2] ss:$0 sm:$0xff] }
   0x4   :  { %126 = vmatpush3.bf16.msra.mxu0 %v125_v5 }
   0x5   :  { %127 = vmatprep.subr.bf16.mxu0 %v133_v0 }
   0x8   :  { %129 = vmatpush3.bf16.msra.mxu0 %v128_v7 }
   0xb   :  { %122 = vmatmul.mubr.msk.f32.vlgmr.msra.gmra.mrb[0].mxu0 %vm26_vm1, %v14_v8 }
  0xde   :  { %v96_v10 = vpop.f32.mrb[0].mxu0 }
  0xdf   :  { %v97_v11 = vadd.f32 %v106_v9, %v96_v10  ;;  %v123_v12 = vpop.f32.mrb[1].mxu0 }
  0xe1   :  { %101 = vst.msk [vmem:[%s180_s3] sm:$0xff] %vm100_vm2, %v97_v11 }

</bundles_post_ra>
